<compile_context>
chip_gen: v6e
topology: v6e:2x2x1
jax: 0.10.0
libtpu: 0.0.40
codegen_flags: <defaults>
</compile_context>

<pallas_src>
import functools

import jax
import jax.numpy as jnp
from jax.experimental import pallas as pl
from jax.experimental.pallas import tpu as pltpu

_K = 768  # fixed input feature dim of nn.Linear(768, d_model)


def _vmem_budget():
    """Per-generation usable VMEM budget (physical capacity minus headroom)."""
    try:
        cap = pltpu.get_tpu_info().vmem_capacity_bytes
    except Exception:
        cap = 64 << 20  # conservative: v7x physical VMEM
    return max(32 << 20, cap - (16 << 20))


_TM_BUCKETS = (1024, 512, 256, 128, 64, 32, 16, 8)


def _choose_tile_m(m, budget):
    """Fixed tm buckets (no per-M recompile churn); block dim == full dim for tiny M."""
    if m <= 8:
        return m  # block first dim equals full array dim -> always legal
    max_tm = 1024 if budget >= (96 << 20) else 512  # 128-MiB parts can go bigger
    for t in _TM_BUCKETS:
        if t <= max_tm and t <= m:
            return t
    return 8


def _tile_footprint(tm, tn, x_bytes, out_bytes):
    """Worst-case (double-buffered) per-step VMEM footprint in bytes."""
    return (2 * tm * _K * x_bytes      # streaming activation tile
            + 2 * _K * tn * 2          # resident bf16 weight
            + 2 * tn * 4               # resident f32 bias
            + 2 * tm * tn * out_bytes  # streaming output tile
            )


def _choose_tiles(m, d_model, budget, x_bytes, out_bytes):
    tm = _choose_tile_m(m, budget)
    limit = int(budget * 0.7)
    if d_model % 128 == 0:
        cands = [d_model] + [c for c in (2048, 1024, 512, 256, 128) if c < d_model]
    else:
        # Block N dim must equal the full array dim when d_model % 128 != 0.
        cands = [d_model]
    tn = cands[-1]
    for c in cands:
        if _tile_footprint(tm, c, x_bytes, out_bytes) <= limit:
            tn = c
            break
    # If a single full-width N tile is mandatory and still too big, shrink tm instead.
    while tm > 8 and _tile_footprint(tm, tn, x_bytes, out_bytes) > limit:
        tm = max(8, tm // 2)
    return tm, tn


def _resident_spec(shape, index_map, nbytes):
    """Single-buffer large resident operands (constant index_map -> 2nd buffer is waste)."""
    if nbytes >= (4 << 20):
        try:
            return pl.BlockSpec(shape, index_map, pipeline_mode=pl.Buffered(1))
        except Exception:  # older jax without pipeline_mode / Buffered
            pass
    return pl.BlockSpec(shape, index_map)


def _linear_kernel(x_ref, w_ref, b_ref, o_ref):
    # x_ref: (tm, 768) tile, w_ref: (768, tn) bf16 (resident), b_ref: (1, tn) f32.
    x = x_ref[...]
    if x.dtype != jnp.bfloat16:
        x = x.astype(jnp.bfloat16)  # native single-pass bf16 MXU path
    acc = jnp.dot(x, w_ref[...], preferred_element_type=jnp.float32)
    o_ref[...] = (acc + b_ref[...]).astype(o_ref.dtype)


@functools.partial(jax.jit, static_argnames=("tm", "tn", "out_dtype", "vmem_limit"))
def _linear_pallas(x2d, w, b2d, *, tm, tn, out_dtype, vmem_limit):
    """(M, 768) @ (768, N) bf16 + (1, N) f32 -> (M, N) out_dtype. Ragged M/N handled."""
    m, k = x2d.shape
    _, n = w.shape
    num_m = pl.cdiv(m, tm)
    num_n = pl.cdiv(n, tn)
    w_spec = _resident_spec((k, tn), lambda i, j: (0, j), k * tn * w.dtype.itemsize)
    return pl.pallas_call(
        _linear_kernel,
        out_shape=jax.ShapeDtypeStruct((m, n), out_dtype),
        grid_spec=pltpu.PrefetchScalarGridSpec(
            num_scalar_prefetch=0,
            grid=(num_m, num_n),
            in_specs=[
                pl.BlockSpec((tm, k), lambda i, j: (i, 0)),  # streaming activations
                w_spec,                                      # resident bf16 weight
                pl.BlockSpec((1, tn), lambda i, j: (0, j)),  # resident f32 bias
            ],
            out_specs=pl.BlockSpec((tm, tn), lambda i, j: (i, j)),
        ),
        compiler_params=pltpu.CompilerParams(
            dimension_semantics=("parallel", "parallel"),
            vmem_limit_bytes=vmem_limit,
        ),
    )(x2d, w, b2d)


class RatEncoderPallas:
    """JAX/Pallas re-implementation of RatEncoder's forward pass."""

    def __init__(self, num_layers, d_model, key, norm=None,
                 out_dtype=jnp.float32, min_pallas_rows=0):
        self.num_layers = num_layers
        self.d_model = d_model
        self.norm = norm
        self.out_dtype = out_dtype
        # Below this many rows a plain fused XLA dot is used (Pallas step overhead
        # dominates). Default 0 keeps everything on the Pallas path for this demo.
        self.min_pallas_rows = min_pallas_rows

        k_w, k_b = jax.random.split(key)
        bound = 1.0 / (_K ** 0.5)
        # PyTorch stores weight as (d_model, 768); keep the transposed (768, d_model)
        # layout so the kernel computes x @ W^T directly.
        self.w = jax.random.uniform(k_w, (_K, d_model), jnp.float32, -bound, bound)
        self.b = jax.random.uniform(k_b, (d_model,), jnp.float32, -bound, bound)
        self.w_bf16 = self.w.astype(jnp.bfloat16)   # resident MXU weight
        self.b2d = self.b.reshape(1, d_model)
        self._vmem_budget = _vmem_budget()

    def _linear(self, x2d):
        m = x2d.shape[0]
        if m < self.min_pallas_rows:
            out = jnp.dot(x2d.astype(jnp.bfloat16), self.w_bf16,
                          preferred_element_type=jnp.float32) + self.b
            return out.astype(self.out_dtype)
        out_bytes = jnp.dtype(self.out_dtype).itemsize
        tm, tn = _choose_tiles(m, self.d_model, self._vmem_budget,
                               x2d.dtype.itemsize, out_bytes)
        need = _tile_footprint(tm, tn, x2d.dtype.itemsize, out_bytes)
        vmem_limit = int(min(self._vmem_budget, max(32 << 20, 2 * need)))
        return _linear_pallas(x2d, self.w_bf16, self.b2d,
                              tm=tm, tn=tn, out_dtype=self.out_dtype,
                              vmem_limit=vmem_limit)

    def __call__(self, sequence, relations):
        # sequence: (batch, seq, 768)
        batch, seq, in_dim = sequence.shape
        assert in_dim == _K
        x2d = sequence.reshape(batch * seq, in_dim)
        output = self._linear(x2d).reshape(batch, seq, self.d_model)

        # TODO(synk): self.layers[i](output, relations) — rat_encoder_layer is an
        # external injected module with no source; loop body not translatable.
        for _ in range(self.num_layers):
            pass

        if self.norm is not None:
            output = self.norm(output)
        return output


if __name__ == "__main__":
    key = jax.random.PRNGKey(0)
    k_seq, k_rel, k_params = jax.random.split(key, 3)

    batch, seq, d_model, num_layers = 2, 8, 32, 2
    sequence = jax.random.normal(k_seq, (batch, seq, 768), dtype=jnp.float32)
    # relations (pairwise relation ids) is only consumed by the external layers.
    relations = jax.random.randint(k_rel, (batch, seq, seq), 0, 10)

    encoder = RatEncoderPallas(num_layers=num_layers, d_model=d_model, key=k_params)
    out = jax.block_until_ready(encoder(sequence, relations))
    assert out.shape == (batch, seq, d_model)

    # Reference with the same bf16-on-MXU / f32-accumulate numerics as the kernel.
    x2d = sequence.reshape(-1, 768)
    ref = (jnp.dot(x2d.astype(jnp.bfloat16), encoder.w.astype(jnp.bfloat16),
                   preferred_element_type=jnp.float32) + encoder.b)
    ref = ref.reshape(batch, seq, d_model)
    assert jnp.allclose(out, ref, atol=2e-3, rtol=2e-3), float(
        jnp.max(jnp.abs(out - ref)))

    # Second check: ragged M (not a tile multiple) exercises the cdiv-grid edge blocks.
    b2, s2 = 3, 67  # m = 201 rows
    seq2 = jax.random.normal(jax.random.PRNGKey(1), (b2, s2, 768), dtype=jnp.float32)
    rel2 = jnp.zeros((b2, s2, s2), dtype=jnp.int32)
    out2 = jax.block_until_ready(encoder(seq2, rel2))
    ref2 = (jnp.dot(seq2.reshape(-1, 768).astype(jnp.bfloat16),
                    encoder.w.astype(jnp.bfloat16),
                    preferred_element_type=jnp.float32) + encoder.b
            ).reshape(b2, s2, d_model)
    assert jnp.allclose(out2, ref2, atol=2e-3, rtol=2e-3), float(
        jnp.max(jnp.abs(out2 - ref2)))

    print("KERNEL_OK")
</pallas_src>

<mosaic_0001>
module attributes {stable_mosaic.version = 11 : i64} {
  func.func @_linear_kernel(%arg0: i32, %arg1: i32, %arg2: memref<16x768xf32, #tpu.memory_space<vmem>>, %arg3: memref<768x32xbf16, #tpu.memory_space<vmem>>, %arg4: memref<1x32xf32, #tpu.memory_space<vmem>>, %arg5: memref<16x32xf32, #tpu.memory_space<vmem>>) attributes {dimension_semantics = [#tpu.dimension_semantics<parallel>, #tpu.dimension_semantics<parallel>], iteration_bounds = array<i64: 1, 1>, scalar_prefetch = 0 : i64, scratch_operands = 0 : i64, tpu.core_type = #tpu.core_type<tc>, window_params = [{transform_indices = @transform_0, window_bounds = array<i64: 16, 768>}, {transform_indices = @transform_1, window_bounds = array<i64: 768, 32>}, {transform_indices = @transform_2, window_bounds = array<i64: 1, 32>}, {transform_indices = @transform_3, window_bounds = array<i64: 16, 32>}]} {
    %c0 = arith.constant 0 : index
    %c0_0 = arith.constant 0 : index
    %0 = vector.load %arg2[%c0, %c0_0] : memref<16x768xf32, #tpu.memory_space<vmem>>, vector<16x768xf32>
    %1 = arith.truncf %0 : vector<16x768xf32> to vector<16x768xbf16>
    %c0_1 = arith.constant 0 : index
    %c0_2 = arith.constant 0 : index
    %2 = vector.load %arg3[%c0_1, %c0_2] : memref<768x32xbf16, #tpu.memory_space<vmem>>, vector<768x32xbf16>
    %cst = arith.constant dense<0.000000e+00> : vector<16x32xf32>
    %3 = tpu.matmul %1, %2, %cst {dimension_numbers = #tpu.dot_dimension_numbers<[1], [0], [0], [1], [0, 0, 1, 1], [], []>} : vector<16x768xbf16>, vector<768x32xbf16>, vector<16x32xf32> -> vector<16x32xf32>
    %c0_3 = arith.constant 0 : index
    %c0_4 = arith.constant 0 : index
    %4 = vector.load %arg4[%c0_3, %c0_4] : memref<1x32xf32, #tpu.memory_space<vmem>>, vector<1x32xf32>
    %5 = vector.broadcast %4 : vector<1x32xf32> to vector<16x32xf32>
    %6 = arith.addf %3, %5 : vector<16x32xf32>
    %c0_5 = arith.constant 0 : index
    %c0_6 = arith.constant 0 : index
    %7 = vector.load %arg5[%c0_5, %c0_6] : memref<16x32xf32, #tpu.memory_space<vmem>>, vector<16x32xf32>
    tpu.vector_store %arg5[%c0_5, %c0_6], %6 {strides = array<i32>} : memref<16x32xf32, #tpu.memory_space<vmem>>, vector<16x32xf32>,
    return
  }
  func.func @transform_0(%arg0: i32, %arg1: i32) -> (i32, i32) {
    %c0_i32 = arith.constant 0 : i32
    %c0_i32_0 = arith.constant 0 : i32
    return %arg0, %c0_i32 : i32, i32
  }
  func.func @transform_1(%arg0: i32, %arg1: i32) -> (i32, i32) {
    %c0_i32 = arith.constant 0 : i32
    %c0_i32_0 = arith.constant 0 : i32
    return %c0_i32, %arg1 : i32, i32
  }
  func.func @transform_2(%arg0: i32, %arg1: i32) -> (i32, i32) {
    %c0_i32 = arith.constant 0 : i32
    %c0_i32_0 = arith.constant 0 : i32
    return %c0_i32, %arg1 : i32, i32
  }
  func.func @transform_3(%arg0: i32, %arg1: i32) -> (i32, i32) {
    %c0_i32 = arith.constant 0 : i32
    return %arg0, %arg1 : i32, i32
  }
}

</mosaic_0001>

<bundles_post_ra>
// kernel: _linear_pallas.1
= control target key start
LH: loop header
LB: loop body
LE: loop exit
PB: predicated region body
PF: predicated region fallthrough
CT: control target
= control target key end

     0   :  { %s964_s0 = inlined_call_operand.vmem [shape: f32[16,768], index: 0, kind: input, shape index: {}]   ;;  %s965_s1 = inlined_call_operand.vmem [shape: bf16[768,32], index: 1, kind: input, shape index: {}]   ;;  %s966_s2 = inlined_call_operand.vmem [shape: f32[1,32], index: 2, kind: input, shape index: {}]   ;;  %s967_s3 = inlined_call_operand.hbm [shape: f32[16,32], index: 3, kind: output, shape index: {}]  }
   0x1   :  { %v685_v0 = vld [vmem:[%s965_s1 + $0x78] sm:$0xff]   ;;  %v689_v4 = vld [vmem:[%s965_s1 + $0x70] sm:$0xff]   ;;  %v693_v8 = vld [vmem:[%s965_s1 + $0x68] sm:$0xff]  }
   0x2   :  { %v686_v1 = vld [vmem:[%s965_s1 + $0x38] sm:$0xff]   ;;  %616 = vmatprep.subr.bf16.mxu0 %v685_v0  ;;  %v690_v5 = vld [vmem:[%s965_s1 + $0x30] sm:$0xff]   ;;  %v694_v9 = vld [vmem:[%s965_s1 + $0x28] sm:$0xff]  }
   0x3   :  { %v687_v2 = vld [vmem:[%s965_s1 + $0xf8] sm:$0xff]   ;;  %617 = vmatpush3.bf16.msra.mxu0 %v686_v1  ;;  %v691_v6 = vld [vmem:[%s965_s1 + $0xf0] sm:$0xff]   ;;  %v695_v10 = vld [vmem:[%s965_s1 + $0xe8] sm:$0xff]  }
   0x4   :  { %v688_v3 = vld [vmem:[%s965_s1 + $0xb8] sm:$0xff]   ;;  %638 = vmatprep.subr.bf16.mxu1 %v687_v2  ;;  %618 = vmatprep.subr.bf16.mxu0 %v689_v4  ;;  %v692_v7 = vld [vmem:[%s965_s1 + $0xb0] sm:$0xff]   ;;  %v696_v11 = vld [vmem:[%s965_s1 + $0xa8] sm:$0xff]  }
   0x5   :  { %639 = vmatpush3.bf16.msra.mxu1 %v688_v3  ;;  %v697_v12 = vld [vmem:[%s965_s1 + $0x60] sm:$0xff]   ;;  %v701_v16 = vld [vmem:[%s965_s1 + $0x58] sm:$0xff]   ;;  %v705_v20 = vld [vmem:[%s965_s1 + $0x50] sm:$0xff]  }
   0x6   :  { %640 = vmatprep.subr.bf16.mxu1 %v691_v6  ;;  %v698_v13 = vld [vmem:[%s965_s1 + $0x20] sm:$0xff]   ;;  %v702_v17 = vld [vmem:[%s965_s1 + $0x18] sm:$0xff]   ;;  %v706_v21 = vld [vmem:[%s965_s1 + $0x10] sm:$0xff]  }
   0x7   :  { %619 = vmatpush3.bf16.msra.mxu0 %v690_v5  ;;  %v699_v14 = vld [vmem:[%s965_s1 + $0xe0] sm:$0xff]   ;;  %v703_v18 = vld [vmem:[%s965_s1 + $0xd8] sm:$0xff]   ;;  %v707_v22 = vld [vmem:[%s965_s1 + $0xd0] sm:$0xff]  }
   0x8   :  { %620 = vmatprep.subr.bf16.mxu0 %v693_v8  ;;  %v700_v15 = vld [vmem:[%s965_s1 + $0xa0] sm:$0xff]   ;;  %v704_v19 = vld [vmem:[%s965_s1 + $0x98] sm:$0xff]   ;;  %v708_v23 = vld [vmem:[%s965_s1 + $0x90] sm:$0xff]  }
   0x9   :  { %641 = vmatpush3.bf16.msra.mxu1 %v692_v7  ;;  %v709_v24 = vld [vmem:[%s965_s1 + $0x48] sm:$0xff]   ;;  %v713_v28 = vld [vmem:[%s965_s1 + $0x40] sm:$0xff]   ;;  %v23_v32 = vld [vmem:[%s964_s0 + $0x38] sm:$0xff] }
   0xa   :  { %642 = vmatprep.subr.bf16.mxu1 %v695_v10  ;;  %v710_v25 = vld [vmem:[%s965_s1 + $0x8] sm:$0xff]   ;;  %v714_v29 = vld [vmem:[%s965_s1] sm:$0xff]   ;;  %v22_v36 = vld [vmem:[%s964_s0 + $0x30] sm:$0xff] }
   0xb   :  { %621 = vmatpush3.bf16.msra.mxu0 %v694_v9  ;;  %v711_v26 = vld [vmem:[%s965_s1 + $0xc8] sm:$0xff]   ;;  %v715_v30 = vld [vmem:[%s965_s1 + $0xc0] sm:$0xff]   ;;  %v717_v38 = vld [vmem:[%s965_s1 + $0x178] sm:$0xff]  }
   0xc   :  { %622 = vmatprep.subr.bf16.mxu0 %v697_v12  ;;  %v712_v27 = vld [vmem:[%s965_s1 + $0x88] sm:$0xff]   ;;  %v716_v34 = vld [vmem:[%s965_s1 + $0x80] sm:$0xff]   ;;  %v19_v39 = vld [vmem:[%s964_s0 + $0x18] sm:$0xff] }
   0xd   :  { %643 = vmatpush3.bf16.msra.mxu1 %v696_v11  ;;  %v17_v31 = vld [vmem:[%s964_s0 + $0x8] sm:$0xff]  ;;  %v16_v35 = vld [vmem:[%s964_s0] sm:$0xff]  ;;  %v718_v42 = vld [vmem:[%s965_s1 + $0x138] sm:$0xff]  }
   0xe   :  { %644 = vmatprep.subr.bf16.mxu1 %v699_v14  ;;  %v29_v33 = vpack.c.bf16 %v23_v32, %v17_v31  ;;  %v28_v37 = vpack.c.bf16 %v22_v36, %v16_v35  ;;  %v25_v40 = vld [vmem:[%s964_s0 + $0x48] sm:$0xff]  ;;  %v18_v43 = vld [vmem:[%s964_s0 + $0x10] sm:$0xff]  ;;  %v24_v44 = vld [vmem:[%s964_s0 + $0x40] sm:$0xff] }
   0xf   :  { %623 = vmatpush3.bf16.msra.mxu0 %v698_v13  ;;  %v31_v41 = vpack.c.bf16 %v25_v40, %v19_v39  ;;  %v30_v45 = vpack.c.bf16 %v24_v44, %v18_v43  ;;  %v719_v46 = vld [vmem:[%s965_s1 + $0x170] sm:$0xff]   ;;  %v721_v48 = vld [vmem:[%s965_s1 + $0x168] sm:$0xff]   ;;  %v723_v50 = vld [vmem:[%s965_s1 + $0x160] sm:$0xff]  }
  0x10   :  { %624 = vmatprep.subr.bf16.mxu0 %v701_v16  ;;  %457 = vmatprep.mubr.bf16.mxu0 %v29_v33  ;;  %v720_v47 = vld [vmem:[%s965_s1 + $0x130] sm:$0xff]   ;;  %v722_v49 = vld [vmem:[%s965_s1 + $0x128] sm:$0xff]   ;;  %v724_v51 = vld [vmem:[%s965_s1 + $0x120] sm:$0xff]  }
  0x11   :  { %645 = vmatpush3.bf16.msra.mxu1 %v700_v15  ;;  %498 = vmatprep.mubr.bf16.mxu1 %v31_v41  ;;  %v725_v52 = vld [vmem:[%s965_s1 + $0x158] sm:$0xff]   ;;  %v727_v54 = vld [vmem:[%s965_s1 + $0x150] sm:$0xff]   ;;  %v21_v55 = vld [vmem:[%s964_s0 + $0x28] sm:$0xff] }
  0x12   :  { %646 = vmatprep.subr.bf16.mxu1 %v703_v18  ;;  %v726_v53 = vld [vmem:[%s965_s1 + $0x118] sm:$0xff]  }
  0x13   :  { %625 = vmatpush3.bf16.msra.mxu0 %v702_v17  ;;  %v27_v56 = vld [vmem:[%s964_s0 + $0x58] sm:$0xff] }
  0x14   :  { %626 = vmatprep.subr.bf16.mxu0 %v705_v20  ;;  %v33_v57 = vpack.c.bf16 %v27_v56, %v21_v55 }
  0x15   :  { %647 = vmatpush3.bf16.msra.mxu1 %v704_v19 }
  0x16   :  { %648 = vmatprep.subr.bf16.mxu1 %v707_v22 }
  0x17   :  { %627 = vmatpush3.bf16.msra.mxu0 %v706_v21 }
  0x18   :  { %628 = vmatprep.subr.bf16.mxu0 %v709_v24 }
  0x19   :  { %649 = vmatpush3.bf16.msra.mxu1 %v708_v23 }
  0x1a   :  { %650 = vmatprep.subr.bf16.mxu1 %v711_v26 }
  0x1b   :  { %629 = vmatpush3.bf16.msra.mxu0 %v710_v25 }
  0x1c   :  { %630 = vmatprep.subr.bf16.mxu0 %v713_v28 }
  0x1d   :  { %651 = vmatpush3.bf16.msra.mxu1 %v712_v27 }
  0x1e   :  { %652 = vmatprep.subr.bf16.mxu1 %v715_v30 }
  0x1f   :  { %631 = vmatpush3.bf16.msra.mxu0 %v714_v29 }
  0x20   :  { %660 = vmatprep.subr.bf16.mxu0 %v717_v38 }
  0x21   :  { %653 = vmatpush3.bf16.msra.mxu1 %v716_v34 }
  0x22   :  { %458 = vmatmul.mubr.bf16.vlgmr.msra.gmra.mxu0 %v28_v37 }
  0x23   :  { %661 = vmatpush3.bf16.msra.mxu0 %v718_v42 }
  0x24   :  { %499 = vmatmul.mubr.bf16.vlgmr.msra.gmra.mxu1 %v30_v45  ;;  %662 = vmatprep.subr.bf16.mxu0 %v719_v46 }
  0x27   :  { %663 = vmatpush3.bf16.msra.mxu0 %v720_v47 }
  0x28   :  { %664 = vmatprep.subr.bf16.mxu0 %v721_v48 }
  0x2b   :  { %665 = vmatpush3.bf16.msra.mxu0 %v722_v49 }
  0x2c   :  { %666 = vmatprep.subr.bf16.mxu0 %v723_v50 }
  0x2f   :  { %667 = vmatpush3.bf16.msra.mxu0 %v724_v51 }
  0x30   :  { %668 = vmatprep.subr.bf16.mxu0 %v725_v52 }
  0x31   :  { %8 = vsyncpa [#allocation3], 0  ;;  %v728_v58 = vld [vmem:[%s965_s1 + $0x110] sm:$0xff]   ;;  %v729_v59 = vld [vmem:[%s965_s1 + $0x148] sm:$0xff]   ;;  %539 = vmatprep.mubr.bf16.mxu0 %v33_v57  ;;  %vm548_vm0 = vcmask 261120  }
  0x32   :  { %v730_v60 = vld [vmem:[%s965_s1 + $0x108] sm:$0xff]   ;;  %v731_v61 = vld [vmem:[%s965_s1 + $0x140] sm:$0xff]   ;;  %v26_v0 = vld [vmem:[%s964_s0 + $0x50] sm:$0xff] }
  0x33   :  { %669 = vmatpush3.bf16.msra.mxu0 %v726_v53  ;;  %v732_v62 = vld [vmem:[%s965_s1 + $0x100] sm:$0xff]  }
  0x34   :  { %670 = vmatprep.subr.bf16.mxu0 %v727_v54  ;;  %v20_v63 = vld [vmem:[%s964_s0 + $0x20] sm:$0xff]  ;;  %s755_s0 = smov [#allocation2]  }
  0x35   :  { %v32_v1 = vpack.c.bf16 %v26_v0, %v20_v63  ;;  %v567_v8 = vld [vmem:[%s966_s2] ss:$0 sm:$0xff]  ;;  %s556_s25 = sshll.u32 %s755_s0, 4  ;;  %s557_s25 = int_to_ptr.vmem [resolvable:$true] %s556_s25 }
  0x36   :  { %s733_s2 = scalar_lea.vmem %s557_s25, 256  ;;  %p738_p1 = scmp.lt.s32.totalorder %s557_s25, %s557_s25 }
  0x37   :  { %671 = vmatpush3.bf16.msra.mxu0 %v728_v58  ;;  %p734_p0 = scmp.ne.s32.totalorder %s557_s25, %s733_s2  ;;  %p739_p2 = scmp.lt.s32.totalorder %s733_s2, %s733_s2 }
  0x38   :  { %672 = vmatprep.subr.bf16.mxu0 %v729_v59 }
  0x39   :  { %p740_p3 = por %p739_p2, %p738_p1 }
  0x3b   :  { %673 = vmatpush3.bf16.msra.mxu0 %v730_v60  ;;  %p741_p4 = pnand %p740_p3, %p734_p0 }
  0x3c   :  { %674 = vmatprep.subr.bf16.mxu0 %v731_v61 }
  0x3f   :  { %675 = vmatpush3.bf16.msra.mxu0 %v732_v62 }
  0x42   :  { %540 = vmatmul.mubr.bf16.vlgmr.msra.gmra.mxu0 %v32_v1 }
  0xe2   :  { %v632_v2 = vpop.f32.mrf.mxu0 }
  0xe4   :  { %v633_v3 = vpop.f32.mrf.mxu0  ;;  %v654_v4 = vpop.f32.mrf.mxu1 }
  0xe5   :  { %v634_v7 = vadd.f32 %v633_v3, %v632_v2 }
  0xe6   :  { %v635_v5 = vpop.f32.mrf.mxu0  ;;  %v655_v6 = vpop.f32.mrf.mxu1 }
  0xe7   :  { %v460_v11 = vadd.f32 %v634_v7, %v567_v8  ;;  %v656_v12 = vadd.f32 %v655_v6, %v654_v4 }
  0xe8   :  { %v636_v9 = vpop.f32.mrf.mxu0  ;;  %v657_v10 = vpop.f32.mrf.mxu1 }
  0xe9   :  { %v637_v13 = vadd.f32 %v636_v9, %v635_v5  ;;  %v501_v17 = vadd.f32 %v656_v12, %v460_v11 }
  0xea   :  { %v658_v14 = vpop.f32.mrf.mxu1 }
  0xeb   :  { %v463_v18 = vadd.f32 %v637_v13, %v567_v8  ;;  %v659_v19 = vadd.f32 %v658_v14, %v657_v10 }
  0xed   :  { %v504_v24 = vadd.f32 %v659_v19, %v463_v18 }
 0x102   :  { %v676_v15 = vpop.f32.mrf.mxu0 }
 0x104   :  { %v677_v16 = vpop.f32.mrf.mxu0 }
 0x105   :  { %v678_v20 = vadd.f32 %v677_v16, %v676_v15 }
 0x106   :  { %v679_v21 = vpop.f32.mrf.mxu0 }
 0x107   :  { %v542_v22 = vadd.f32 %v678_v20, %v501_v17 }
 0x108   :  { %v680_v23 = vpop.f32.mrf.mxu0 }
 0x109   :  { %549 = vst.msk [vmem:[#allocation2] sm:$0xff] %vm548_vm0, %v542_v22  ;;  %v681_v25 = vadd.f32 %v680_v23, %v679_v21 }
 0x10b   :  { %v545_v26 = vadd.f32 %v681_v25, %v504_v24 }
 0x10d   :  { %550 = vst.msk [vmem:[#allocation2 + $0x8] sm:$0xff] %vm548_vm0, %v545_v26 }
 0x10e   :  { %744 = shalt.err (!%p741_p4)
}
 0x10f   :  { %s756_s26 = smov 128   ;;  %s757_s27 = smov 8  }
 0x110   :  { %562 = dma.vmem_to_hbm [thread:$0]  %s557_s25, 256, %s967_s3, [#allocation3], %s756_s26, %s756_s26, %s757_s27  }
 0x111   :  { %753 = dma.done.wait [#allocation3], 256  }
 0x112   :  { %754 = vsyncadd [#allocation3], 4294967040 }
 0x113   :  { %566 = vsyncpa [#allocation3], 1 }

</bundles_post_ra>
